<compile_context>
chip_gen: v7x
topology: tpu7x:2x2x1
jax: 0.10.0
libtpu: 0.0.40
codegen_flags: <defaults>
</compile_context>

<pallas_src>
import functools

import jax
import jax.numpy as jnp
from jax.experimental import pallas as pl
from jax.experimental.pallas import tpu as pltpu

_LANE = 128
_SUBLANE = 8


def _round_up(x, m):
    return (x + m - 1) // m * m


def _pick_h_tile(h_out, target):
    """Largest divisor of h_out that is <= target; whole extent if none > 1."""
    best = 1
    for d in range(1, min(h_out, target) + 1):
        if h_out % d == 0:
            best = d
    if best == 1:
        best = h_out
    return best


def _conv2d_kernel(x_ref, w_ref, b_ref, o_ref, *, ksize):
    # x_ref: (1, Hp, Wp, Cin)         full zero-padded image for batch n
    #                                 (block index ignores h -> revisited,
    #                                  not re-DMA'd, across row tiles)
    # w_ref: (KH*KW*Cin, Cout_pad)    conv weight flattened to a matmul RHS
    # b_ref: (1, Cout_pad)
    # o_ref: (1, TH, W_out, Cout_pad) lane-dense output row tile
    _, th, w_out, cout = o_ref.shape
    cin = x_ref.shape[-1]
    kh_sz = kw_sz = ksize

    # Rows of the padded image needed by this output row tile. Leading-axis
    # dynamic slice -> cheap address offset (no sublane relayout).
    row0 = pl.multiple_of(pl.program_id(1) * th, th)
    x_rows = x_ref[0, pl.ds(row0, th + kh_sz - 1), :, :]  # (TH+KH-1, Wp, Cin)

    # im2col: make the KW sublane-shifted copies once (not KH*KW times); the
    # KH shift is a free leading-axis slice. Concatenate all taps along the
    # channel axis so the whole conv is a single MXU matmul with contraction
    # KH*KW*Cin (accumulation lives inside the MXU; no scratch accumulator).
    shifted = [x_rows[:, kw:kw + w_out, :] for kw in range(kw_sz)]
    taps = []
    for kh in range(kh_sz):
        for kw in range(kw_sz):
            taps.append(shifted[kw][kh:kh + th].reshape(th * w_out, cin))
    patch = jnp.concatenate(taps, axis=-1)                 # (TH*W, KH*KW*Cin)

    acc = jnp.dot(patch, w_ref[...], preferred_element_type=jnp.float32)
    acc = acc + b_ref[...]                                 # (TH*W, Cout_pad)
    o_ref[...] = acc.reshape(1, th, w_out, cout).astype(o_ref.dtype)


@functools.partial(jax.jit, static_argnames=("kernel_size", "block_h"))
def conv2d_forward(x_nchw, w_oihw, bias, kernel_size, block_h=8):
    """Equivalent of nn.Conv2d(Cin, Cout, kernel_size, padding=kernel_size//2).

    Handles odd AND even kernel sizes (even kernels give (H+1, W+1) outputs,
    matching PyTorch's padding=k//2 behavior).
    """
    pad = kernel_size // 2
    n_batch, cin, h, w = x_nchw.shape
    cout = w_oihw.shape[0]
    kh = kw = kernel_size
    hp, wp = h + 2 * pad, w + 2 * pad
    h_out = hp - kh + 1
    w_out = wp - kw + 1
    cout_pad = _round_up(cout, _LANE)       # lane-dense output store

    # Layout glue (NCHW -> NHWC activations, OIHW -> flattened matmul weight).
    # TODO(synk): fuse the transpose + zero-pad into the kernel (masked halo)
    #   to save the extra full-tensor HBM round trips around the conv.
    x = jnp.transpose(x_nchw, (0, 2, 3, 1))
    x = jnp.pad(x, ((0, 0), (pad, pad), (pad, pad), (0, 0)))
    w_mat = jnp.transpose(w_oihw, (2, 3, 1, 0)).reshape(kh * kw * cin, cout)
    b_vec = bias
    if cout_pad != cout:
        w_mat = jnp.pad(w_mat, ((0, 0), (0, cout_pad - cout)))
        b_vec = jnp.pad(b_vec, (0, cout_pad - cout))
    b_mat = b_vec.reshape(1, cout_pad)

    th = _pick_h_tile(h_out, block_h)
    grid = (n_batch, h_out // th)

    # Explicit scoped-VMEM budget: double-buffered blocks + im2col temporary.
    def vb(shape, dt):
        s = list(shape)
        s[-1] = _round_up(s[-1], _LANE)
        if len(s) >= 2:
            s[-2] = _round_up(s[-2], _SUBLANE)
        total = 1
        for d in s:
            total *= d
        return total * jnp.dtype(dt).itemsize

    est = 2 * (vb((1, hp, wp, cin), x.dtype)
               + vb(w_mat.shape, w_mat.dtype)
               + vb(b_mat.shape, b_mat.dtype)
               + vb((1, th, w_out, cout_pad), x.dtype)
               + vb((th * w_out, kh * kw * cin), jnp.float32))
    vmem_limit = int(min(64 * 2**20, max(32 * 2**20, 2 * est)))

    kernel = functools.partial(_conv2d_kernel, ksize=kernel_size)

    out_nhwc = pl.pallas_call(
        kernel,
        out_shape=jax.ShapeDtypeStruct((n_batch, h_out, w_out, cout_pad),
                                       x.dtype),
        grid_spec=pltpu.PrefetchScalarGridSpec(
            num_scalar_prefetch=0,
            grid=grid,
            in_specs=[
                # Whole padded image per batch element; block index ignores h,
                # so the tile is reused (no re-DMA) across the row tiles.
                pl.BlockSpec((1, hp, wp, cin), lambda n, hh: (n, 0, 0, 0)),
                pl.BlockSpec((kh * kw * cin, cout_pad), lambda n, hh: (0, 0)),
                pl.BlockSpec((1, cout_pad), lambda n, hh: (0, 0)),
            ],
            out_specs=pl.BlockSpec((1, th, w_out, cout_pad),
                                   lambda n, hh: (n, hh, 0, 0)),
        ),
        compiler_params=pltpu.CompilerParams(
            dimension_semantics=("parallel", "parallel"),
            vmem_limit_bytes=vmem_limit),
    )(x, w_mat, b_mat)

    out_nhwc = out_nhwc[..., :cout]
    return jnp.transpose(out_nhwc, (0, 3, 1, 2))            # NHWC -> NCHW


def _reference_conv(x_nchw, w_oihw, bias, kernel_size):
    pad = kernel_size // 2
    y = jax.lax.conv_general_dilated(
        x_nchw, w_oihw,
        window_strides=(1, 1),
        padding=((pad, pad), (pad, pad)),
        dimension_numbers=("NCHW", "OIHW", "NCHW"))
    return y + bias.reshape(1, -1, 1, 1)


if __name__ == "__main__":
    # Module config (synthetic, deterministic init).
    in_channels, out_channels, kernel_size = 4, 8, 3
    N, H, W = 2, 16, 16

    key = jax.random.PRNGKey(0)
    kx, kw_key, kb, kw2 = jax.random.split(key, 4)

    x = jax.random.normal(kx, (N, in_channels, H, W), dtype=jnp.float32)

    # nn.Conv2d parameter shapes: weight (Cout, Cin, K, K), bias (Cout,)
    fan_in = in_channels * kernel_size * kernel_size
    bound = 1.0 / jnp.sqrt(jnp.float32(fan_in))
    weight = jax.random.uniform(
        kw_key, (out_channels, in_channels, kernel_size, kernel_size),
        dtype=jnp.float32, minval=-bound, maxval=bound)
    bias = jax.random.uniform(
        kb, (out_channels,), dtype=jnp.float32, minval=-bound, maxval=bound)

    out = conv2d_forward(x, weight, bias, kernel_size=kernel_size)
    out = jax.block_until_ready(out)

    ref = _reference_conv(x, weight, bias, kernel_size)
    assert out.shape == (N, out_channels, H, W)
    assert jnp.allclose(out, ref, atol=1e-5, rtol=1e-5)

    # Even kernel size: padding=k//2 gives an (H+1, W+1) output in PyTorch;
    # this is now reproduced instead of silently truncating to (H, W).
    k_even = 2
    weight_even = jax.random.uniform(
        kw2, (out_channels, in_channels, k_even, k_even),
        dtype=jnp.float32, minval=-bound, maxval=bound)
    out_even = conv2d_forward(x, weight_even, bias, kernel_size=k_even)
    out_even = jax.block_until_ready(out_even)
    ref_even = _reference_conv(x, weight_even, bias, k_even)
    assert out_even.shape == (N, out_channels, H + 1, W + 1)
    assert jnp.allclose(out_even, ref_even, atol=1e-5, rtol=1e-5)

    print("KERNEL_OK")
</pallas_src>

<mosaic_0001>
module attributes {stable_mosaic.version = 11 : i64} {
  func.func @_conv2d_kernel(%arg0: i32, %arg1: i32, %arg2: memref<1x18x18x4xf32, #tpu.memory_space<vmem>>, %arg3: memref<36x128xf32, #tpu.memory_space<vmem>>, %arg4: memref<1x128xf32, #tpu.memory_space<vmem>>, %arg5: memref<1x8x16x128xf32, #tpu.memory_space<vmem>>) attributes {dimension_semantics = [#tpu.dimension_semantics<parallel>, #tpu.dimension_semantics<parallel>], iteration_bounds = array<i64: 2, 2>, scalar_prefetch = 0 : i64, scratch_operands = 0 : i64, tpu.core_type = #tpu.core_type<tc>, window_params = [{transform_indices = @transform_0, window_bounds = array<i64: 1, 18, 18, 4>}, {pipeline_mode = #tpu.pipeline_mode<synchronous>, transform_indices = @transform_1, window_bounds = array<i64: 36, 128>}, {pipeline_mode = #tpu.pipeline_mode<synchronous>, transform_indices = @transform_2, window_bounds = array<i64: 1, 128>}, {transform_indices = @transform_3, window_bounds = array<i64: 1, 8, 16, 128>}]} {
    %c8_i32 = arith.constant 8 : i32
    %0 = arith.muli %arg1, %c8_i32 : i32
    %1 = tpu.assume_multiple %0, 8 : i32
    %c0 = arith.constant 0 : index
    %2 = arith.index_cast %1 : i32 to index
    %c0_0 = arith.constant 0 : index
    %c0_1 = arith.constant 0 : index
    %3 = vector.load %arg2[%c0, %2, %c0_0, %c0_1] : memref<1x18x18x4xf32, #tpu.memory_space<vmem>>, vector<1x10x18x4xf32>
    %4 = vector.shape_cast %3 : vector<1x10x18x4xf32> to vector<10x18x4xf32>
    %5 = vector.extract_strided_slice %4 {offsets = [0, 0, 0], sizes = [10, 16, 4], strides = [1, 1, 1]} : vector<10x18x4xf32> to vector<10x16x4xf32>
    %6 = vector.extract_strided_slice %4 {offsets = [0, 1, 0], sizes = [10, 16, 4], strides = [1, 1, 1]} : vector<10x18x4xf32> to vector<10x16x4xf32>
    %7 = vector.extract_strided_slice %4 {offsets = [0, 2, 0], sizes = [10, 16, 4], strides = [1, 1, 1]} : vector<10x18x4xf32> to vector<10x16x4xf32>
    %8 = vector.extract_strided_slice %5 {offsets = [0, 0, 0], sizes = [8, 16, 4], strides = [1, 1, 1]} : vector<10x16x4xf32> to vector<8x16x4xf32>
    %9 = vector.shape_cast %8 : vector<8x16x4xf32> to vector<128x4xf32>
    %10 = vector.extract_strided_slice %6 {offsets = [0, 0, 0], sizes = [8, 16, 4], strides = [1, 1, 1]} : vector<10x16x4xf32> to vector<8x16x4xf32>
    %11 = vector.shape_cast %10 : vector<8x16x4xf32> to vector<128x4xf32>
    %12 = vector.extract_strided_slice %7 {offsets = [0, 0, 0], sizes = [8, 16, 4], strides = [1, 1, 1]} : vector<10x16x4xf32> to vector<8x16x4xf32>
    %13 = vector.shape_cast %12 : vector<8x16x4xf32> to vector<128x4xf32>
    %14 = vector.extract_strided_slice %5 {offsets = [1, 0, 0], sizes = [8, 16, 4], strides = [1, 1, 1]} : vector<10x16x4xf32> to vector<8x16x4xf32>
    %15 = vector.shape_cast %14 : vector<8x16x4xf32> to vector<128x4xf32>
    %16 = vector.extract_strided_slice %6 {offsets = [1, 0, 0], sizes = [8, 16, 4], strides = [1, 1, 1]} : vector<10x16x4xf32> to vector<8x16x4xf32>
    %17 = vector.shape_cast %16 : vector<8x16x4xf32> to vector<128x4xf32>
    %18 = vector.extract_strided_slice %7 {offsets = [1, 0, 0], sizes = [8, 16, 4], strides = [1, 1, 1]} : vector<10x16x4xf32> to vector<8x16x4xf32>
    %19 = vector.shape_cast %18 : vector<8x16x4xf32> to vector<128x4xf32>
    %20 = vector.extract_strided_slice %5 {offsets = [2, 0, 0], sizes = [8, 16, 4], strides = [1, 1, 1]} : vector<10x16x4xf32> to vector<8x16x4xf32>
    %21 = vector.shape_cast %20 : vector<8x16x4xf32> to vector<128x4xf32>
    %22 = vector.extract_strided_slice %6 {offsets = [2, 0, 0], sizes = [8, 16, 4], strides = [1, 1, 1]} : vector<10x16x4xf32> to vector<8x16x4xf32>
    %23 = vector.shape_cast %22 : vector<8x16x4xf32> to vector<128x4xf32>
    %24 = vector.extract_strided_slice %7 {offsets = [2, 0, 0], sizes = [8, 16, 4], strides = [1, 1, 1]} : vector<10x16x4xf32> to vector<8x16x4xf32>
    %25 = vector.shape_cast %24 : vector<8x16x4xf32> to vector<128x4xf32>
    %26 = tpu.concatenate %9, %11, %13, %15, %17, %19, %21, %23, %25 in 1 : vector<128x4xf32>, vector<128x4xf32>, vector<128x4xf32>, vector<128x4xf32>, vector<128x4xf32>, vector<128x4xf32>, vector<128x4xf32>, vector<128x4xf32>, vector<128x4xf32> -> vector<128x36xf32>
    %c0_2 = arith.constant 0 : index
    %c0_3 = arith.constant 0 : index
    %27 = vector.load %arg3[%c0_2, %c0_3] : memref<36x128xf32, #tpu.memory_space<vmem>>, vector<36x128xf32>
    %cst = arith.constant dense<0.000000e+00> : vector<128x128xf32>
    %28 = tpu.matmul %26, %27, %cst {dimension_numbers = #tpu.dot_dimension_numbers<[1], [0], [0], [1], [0, 0, 1, 1], [], []>} : vector<128x36xf32>, vector<36x128xf32>, vector<128x128xf32> -> vector<128x128xf32>
    %c0_4 = arith.constant 0 : index
    %c0_5 = arith.constant 0 : index
    %29 = vector.load %arg4[%c0_4, %c0_5] : memref<1x128xf32, #tpu.memory_space<vmem>>, vector<1x128xf32>
    %30 = vector.broadcast %29 : vector<1x128xf32> to vector<128x128xf32>
    %31 = arith.addf %28, %30 : vector<128x128xf32>
    %32 = vector.shape_cast %31 : vector<128x128xf32> to vector<1x8x16x128xf32>
    %c0_6 = arith.constant 0 : index
    %c0_7 = arith.constant 0 : index
    %c0_8 = arith.constant 0 : index
    %c0_9 = arith.constant 0 : index
    %33 = vector.load %arg5[%c0_6, %c0_7, %c0_8, %c0_9] : memref<1x8x16x128xf32, #tpu.memory_space<vmem>>, vector<1x8x16x128xf32>
    tpu.vector_store %arg5[%c0_6, %c0_7, %c0_8, %c0_9], %32 {strides = array<i32>} : memref<1x8x16x128xf32, #tpu.memory_space<vmem>>, vector<1x8x16x128xf32>,
    return
  }
  func.func @transform_0(%arg0: i32, %arg1: i32) -> (i32, i32, i32, i32) {
    %c0_i32 = arith.constant 0 : i32
    %c0_i32_0 = arith.constant 0 : i32
    %c0_i32_1 = arith.constant 0 : i32
    %c0_i32_2 = arith.constant 0 : i32
    return %arg0, %c0_i32, %c0_i32_0, %c0_i32_1 : i32, i32, i32, i32
  }
  func.func @transform_1(%arg0: i32, %arg1: i32) -> (i32, i32) {
    %c0_i32 = arith.constant 0 : i32
    %c0_i32_0 = arith.constant 0 : i32
    %c0_i32_1 = arith.constant 0 : i32
    return %c0_i32, %c0_i32_0 : i32, i32
  }
  func.func @transform_2(%arg0: i32, %arg1: i32) -> (i32, i32) {
    %c0_i32 = arith.constant 0 : i32
    %c0_i32_0 = arith.constant 0 : i32
    %c0_i32_1 = arith.constant 0 : i32
    return %c0_i32, %c0_i32_0 : i32, i32
  }
  func.func @transform_3(%arg0: i32, %arg1: i32) -> (i32, i32, i32, i32) {
    %c0_i32 = arith.constant 0 : i32
    %c0_i32_0 = arith.constant 0 : i32
    %c0_i32_1 = arith.constant 0 : i32
    return %arg0, %arg1, %c0_i32, %c0_i32_0 : i32, i32, i32, i32
  }
}

</mosaic_0001>

<bundles_post_ra>
// kernel: conv2d_forward.1
= control target key start
LH: loop header
LB: loop body
LE: loop exit
PB: predicated region body
PF: predicated region fallthrough
CT: control target
= control target key end

     0   :  { %s1417_s12 = smov 0   ;;  %s1419_s13 = smov 0   ;;  %s2140_s0 = inlined_call_operand.vmem [shape: f32[2,18,18,4], index: 0, kind: input, shape index: {}]   ;;  %s2141_s1 = inlined_call_operand.vmem [shape: f32[36,128], index: 1, kind: input, shape index: {}]   ;;  %s2142_s2 = inlined_call_operand.vmem [shape: f32[1,128], index: 2, kind: input, shape index: {}]   ;;  %s2143_s3 = inlined_call_operand.vmem [shape: f32[2,16,16,128], index: 3, kind: output, shape index: {}]  }
   0x1   :  { %s1421_s14 = smov 0   ;;  %s1423_s15 = smov 0  }
   0x2   :  { %s1425_s16 = smov 0  }
   0x3 LB: > { %s22_s17 = sadd.s32 1, %s1379_s14  ;;  %s25_s18 = sadd.s32 1, %s1383_s15  ;;  %s1387_s16 = sphi %s1425_s16, %s13_s16   ;;  %s1383_s15 = sphi %s1423_s15, %s2174_s15   ;;  %s1379_s14 = sphi %s1421_s14, %s2173_s14   ;;  %s1375_s13 = sphi %s1419_s13, %s2172_s13   ;;  %s1371_s12 = sphi %s1417_s12, %s2171_s12  }
   0x4   : > { %p23_p0 = scmp.ge.s32.totalorder %s22_s17, 2  ;;  %p1203_p1 = scmp.ge.s32.totalorder %s1387_s16, 1 }
   0x5   : > { %p151_p2 = scmp.lt.s32.totalorder %s1387_s16, 5 }
   0x6   : > { %s2176_s17 = smov (%p23_p0, %s22_s17), 0  ;;  %s2178_s18 = smov (!%p23_p0, %s25_s18), %s1383_s15 }
   0x7   : > { %p152_p3 = pnand %p1203_p1, %p151_p2  ;;  %p27_p4 = scmp.ge.s32.totalorder %s2178_s18, 2 }
   0x9   : > { %s2180_s18 = smov (%p27_p4, %s2178_s18), 0  ;;  %155 = sbr.rel (%p152_p3) target bundleno = 612 (0x264), region = 32 }
  0x10   : > { %p180_p5 = scmp.lt.s32.totalorder %s1375_s13, 1  ;;  %s1210_s19 = smul.u32 192, %s1371_s12  ;;  %vm253_vm0 = vcmask 1046528   ;;  %vm294_vm1 = vcmask 1045504   ;;  %vm942_vm2 = vcmask 1043456   ;;  %vm745_vm3 = vcmask 31744  }
  0x11   : > { %s1389_s25 = smov 4   ;;  %s1390_s26 = smov 8   ;;  %vm762_vm4 = vcmask 64512   ;;  %vm779_vm5 = vcmask 97280   ;;  %vm796_vm6 = vcmask 130048   ;;  %vm813_vm7 = vcmask 162816  }
  0x12   : > { %s2182_s13 = smov (!%p180_p5, %s1375_s13), 1  ;;  %s1391_s27 = smov 12   ;;  %vm830_vm8 = vcmask 195584   ;;  %vm847_vm9 = vcmask 228352   ;;  %vm864_vm10 = vcmask 261120   ;;  %vm893_vm11 = vcmask 293888  }
  0x13   : > { %s1300_s20 = smul.u32 432, %s2182_s13  ;;  %s1392_s28 = smov 16  }
  0x14   : > { %s1393_s29 = smov 20   ;;  %s1394_s30 = smov 24  }
  0x15   : > { %s184_s23 = scalar_lea.vmem %s2140_s0, %s1300_s20  ;;  %s1395_s4 = smov 28  }
  0x16   : > { %s1456_s24 = scalar_lea.vmem %s184_s23, %s1210_s19  ;;  %s1396_s20 = smov 32  }
  0x17   : > { %v1459_v0 = vld [vmem:[%s1456_s24 + $0x8] sm:$0xff]  ;;  %v201_v1 = vld [vmem:[%s1456_s24 + $0x10] sm:$0x3]  ;;  %v1463_v2 = vld [vmem:[%s1456_s24] sm:$0xff]  ;;  %s1205_s23 = sshll.u32 %s1371_s12, 3 }
  0x18   : > { %v255_v3 = vrot.slane %v1459_v0, 1  ;;  %v257_v4 = vrot.slane %v201_v1, 1  ;;  %v254_v5 = vrot.slane %v1463_v2, 1  ;;  %v1468_v6 = vld [vmem:[%s1456_s24 + $0x68] sm:$0xff]  ;;  %v213_v7 = vld [vmem:[%s1456_s24 + $0x70] sm:$0x3] }
  0x19   : > { %v275_v8 = vrot.slane %v1468_v6, 1  ;;  %v277_v9 = vrot.slane %v213_v7, 1  ;;  %v1473_v10 = vld [vmem:[%s1456_s24 + $0x60] sm:$0xff]  ;;  %v316_v14 = vrot.slane %v1468_v6, 2  ;;  %v295_v15 = vrot.slane %v1463_v2, 2  ;;  %v1509_v26 = vld [vmem:[%s1456_s24 + $0x78] sm:$0xff] }
  0x1a   : > { %v258_v11 = vsel %vm253_vm0, %v255_v3, %v257_v4  ;;  %v256_v12 = vsel %vm253_vm0, %v254_v5, %v255_v3  ;;  %v274_v13 = vrot.slane %v1473_v10, 1  ;;  %v315_v18 = vrot.slane %v1473_v10, 2  ;;  %v1512_v27 = vld [vmem:[%s1456_s24 + $0x18] sm:$0xff]  ;;  %v1515_v28 = vld [vmem:[%s1456_s24 + $0x80] sm:$0xff]  ;;  %v216_v36 = vld [vmem:[%s1456_s24 + $0x88] sm:$0x3] }
  0x1b   : > { %363 = vrot.lane.b32.xlu1 %v258_v11, %s1389_s25  ;;  %361 = vrot.lane.b32.xlu0 %v256_v12, %s1389_s25  ;;  %v1483_v16 = vsel %vm253_vm0, %v275_v8, %v277_v9  ;;  %v296_v19 = vrot.slane %v1459_v0, 2  ;;  %v318_v22 = vrot.slane %v213_v7, 2  ;;  %v298_v23 = vrot.slane %v201_v1, 2  ;;  %v1518_v29 = vld [vmem:[%s1456_s24 + $0x20] sm:$0xff]  ;;  %v204_v37 = vld [vmem:[%s1456_s24 + $0x28] sm:$0x3] }
  0x1c   : > { %v1486_v17 = vsel %vm253_vm0, %v274_v13, %v275_v8  ;;  %v1495_v20 = vsel %vm294_vm1, %v315_v18, %v316_v14  ;;  %v279_v30 = vrot.slane %v1509_v26, 1  ;;  %v280_v31 = vrot.slane %v1515_v28, 1  ;;  %v1576_v52 = vld [vmem:[%s1456_s24 + $0x90] sm:$0xff]  ;;  %v1589_v54 = vld [vmem:[%s1456_s24 + $0x98] sm:$0xff]  ;;  %v219_v62 = vld [vmem:[%s1456_s24 + $0xa0] sm:$0x3] }
  0x1d   : > { %v297_v21 = vsel %vm294_vm1, %v295_v15, %v296_v19  ;;  %v1502_v24 = vsel %vm294_vm1, %v316_v14, %v318_v22  ;;  %v299_v25 = vsel %vm294_vm1, %v296_v19, %v298_v23  ;;  %v259_v32 = vrot.slane %v1512_v27, 1  ;;  %v1579_v53 = vld [vmem:[%s1456_s24 + $0x30] sm:$0xff]  ;;  %v1592_v55 = vld [vmem:[%s1456_s24 + $0x38] sm:$0xff]  ;;  %v207_v63 = vld [vmem:[%s1456_s24 + $0x40] sm:$0x3]  ;;  %p188_p6 = scmp.lt.s32.totalorder %s1205_s23, 15 }
  0x1e   : > { %v260_v33 = vrot.slane %v1518_v29, 1  ;;  %v1533_v34 = vsel %vm253_vm0, %v279_v30, %v280_v31  ;;  %v282_v38 = vrot.slane %v216_v36, 1  ;;  %v262_v39 = vrot.slane %v204_v37, 1  ;;  %2157 = vst [vmem:[#allocation6_spill] sm:$0xff] %v1592_v55  ;;  %v881_v8 = vld [vmem:[%s2141_s1] sm:$0xff]  ;;  %v882_v9 = vld [vmem:[%s2141_s1 + $0x8] sm:$0xff] }
  0x1f   : > { %379 = vrot.lane.b32.xlu1 %v1483_v16, %s1389_s25  ;;  %377 = vrot.lane.b32.xlu0 %v1486_v17, %s1389_s25  ;;  %2153 = vst [vmem:[#allocation2_spill] sm:$0xff] %v1533_v34  ;;  %v320_v40 = vrot.slane %v1509_v26, 2  ;;  %v321_v41 = vrot.slane %v1515_v28, 2  ;;  %v300_v44 = vrot.slane %v1512_v27, 2  ;;  %v301_v45 = vrot.slane %v1518_v29, 2  ;;  %v883_v15 = vld [vmem:[%s2141_s1 + $0x10] sm:$0xff] }
  0x20   : > { %v261_v35 = vsel %vm253_vm0, %v259_v32, %v260_v33  ;;  %v1547_v42 = vsel %vm253_vm0, %v280_v31, %v282_v38  ;;  %v263_v43 = vsel %vm253_vm0, %v260_v33, %v262_v39  ;;  %v323_v48 = vrot.slane %v216_v36, 2  ;;  %v884_v18 = vld [vmem:[%s2141_s1 + $0x18] sm:$0xff]  ;;  %v885_v23 = vld [vmem:[%s2141_s1 + $0x20] sm:$0xf]  ;;  %v1662_v33 = vld [vmem:[%s1456_s24 + $0xa8] sm:$0xff]  ;;  %s2184_s23 = smov (!%p188_p6, %s1205_s23), 15 }
  0x21   : > { %2154 = vst [vmem:[#allocation3_spill] sm:$0xff] %v1547_v42  ;;  %v1556_v46 = vsel %vm294_vm1, %v320_v40, %v321_v41  ;;  %v302_v47 = vsel %vm294_vm1, %v300_v44, %v301_v45  ;;  %v303_v49 = vrot.slane %v204_v37, 2  ;;  %v284_v56 = vrot.slane %v1576_v52, 1  ;;  %2158 = vst [vmem:[#allocation7_spill] sm:$0xff] %v1662_v33  ;;  %v1689_v44 = vld [vmem:[%s1456_s24 + $0x50] sm:$0xff] }
  0x22   : > { %2155 = vst [vmem:[#allocation4_spill] sm:$0xff] %v1556_v46  ;;  %v1569_v50 = vsel %vm294_vm1, %v321_v41, %v323_v48  ;;  %v285_v57 = vrot.slane %v1589_v54, 1  ;;  %v264_v58 = vrot.slane %v1579_v53, 1  ;;  %v265_v59 = vrot.slane %v1592_v55, 1  ;;  %2161 = vst [vmem:[#allocation10_spill] sm:$0xff] %v1689_v44 }
  0x23   : > { %425 = vrot.lane.b32.xlu1 %v1495_v20, %s1390_s26  ;;  %409 = vrot.lane.b32.xlu0 %v297_v21, %s1390_s26  ;;  %2156 = vst [vmem:[#allocation5_spill] sm:$0xff] %v1569_v50  ;;  %v304_v51 = vsel %vm294_vm1, %v301_v45, %v303_v49  ;;  %v287_v1 = vrot.slane %v219_v62, 1  ;;  %v267_v3 = vrot.slane %v207_v63, 1  ;;  %v325_v4 = vrot.slane %v1576_v52, 2 }
  0x24   : > { %v286_v60 = vsel %vm253_vm0, %v284_v56, %v285_v57  ;;  %v266_v61 = vsel %vm253_vm0, %v264_v58, %v265_v59  ;;  %v326_v5 = vrot.slane %v1589_v54, 2  ;;  %v305_v7 = vrot.slane %v1579_v53, 2 }
  0x25   : > { %v288_v11 = vsel %vm253_vm0, %v285_v57, %v287_v1  ;;  %v268_v12 = vsel %vm253_vm0, %v265_v59, %v267_v3  ;;  %v306_v13 = vrot.slane %v1592_v55, 2  ;;  %v1286_v14 = vpack.c.bf16 %v882_v9, %v881_v8 }
  0x26   : > { %v327_v19 = vsel %vm294_vm1, %v325_v4, %v326_v5  ;;  %v1290_v22 = vpack.c.bf16 %v884_v18, %v883_v15  ;;  %v308_v30 = vrot.slane %v207_v63, 2  ;;  %v289_v45 = vrot.slane %v1662_v33, 1 }
  0x27   : > { %427 = vrot.lane.b32.xlu1 %v1502_v24, %s1390_s26  ;;  %411 = vrot.lane.b32.xlu0 %v299_v25, %s1390_s26  ;;  %v307_v21 = vsel %vm294_vm1, %v305_v7, %v306_v13  ;;  %v328_v25 = vrot.slane %v219_v62, 2  ;;  %v270_v49 = vrot.slane %v1689_v44, 1  ;;  %v210_v62 = vld [vmem:[%s1456_s24 + $0x58] sm:$0x3] }
  0x28   : > { %1287 = vmatprep.subr.bf16.mxu0 %v1286_v14  ;;  %1294 = vmatprep.subr.bf16.mxu1 %v1286_v14  ;;  %v309_v32 = vsel %vm294_vm1, %v306_v13, %v308_v30  ;;  %v272_v4 = vrot.slane %v210_v62, 1 }
  0x29   : > { %1289 = vmatpush3.bf16.msra.mxu0 %v1286_v14  ;;  %1297 = vmatpush3.bf16.msra.mxu1 %v1286_v14  ;;  %v329_v31 = vsel %vm294_vm1, %v326_v5, %v328_v25  ;;  %v311_v14 = vrot.slane %v1689_v44, 2 }
  0x2a   : > { %1291 = vmatprep.subr.bf16.mxu0 %v1290_v22  ;;  %1295 = vmatprep.subr.bf16.mxu1 %v1290_v22  ;;  %v273_v9 = vsel %vm253_vm0, %v270_v49, %v272_v4 }
  0x2b   : > { %473 = vrot.lane.b32.xlu1 %v1509_v26, %s1391_s27  ;;  %457 = vrot.lane.b32.xlu0 %v1512_v27, %s1391_s27 }
  0x2d   : > { %1293 = vmatpush3.bf16.msra.mxu0 %v1290_v22  ;;  %1298 = vmatpush3.bf16.msra.mxu1 %v1290_v22 }
  0x2e   : > { %1260 = vmatprep.subr.msk.mxu0 %vm942_vm2, %v885_v23  ;;  %1296 = vmatprep.subr.msk.mxu1 %vm942_vm2, %v885_v23 }
  0x2f   : > { %475 = vrot.lane.b32.xlu1 %v1515_v28, %s1391_s27  ;;  %459 = vrot.lane.b32.xlu0 %v1518_v29, %s1391_s27 }
  0x31   : > { %1261 = vmatpush3.msk.msra.mxu0 %vm942_vm2, %v885_v23  ;;  %1299 = vmatpush3.msk.msra.mxu1 %vm942_vm2, %v885_v23 }
  0x33   : > { %521 = vrot.lane.b32.xlu1 %v1533_v34, %s1392_s28  ;;  %505 = vrot.lane.b32.xlu0 %v261_v35, %s1392_s28 }
  0x37   : > { %381 = vrot.lane.b32.xlu1 %v1533_v34, %s1389_s25  ;;  %365 = vrot.lane.b32.xlu0 %v261_v35, %s1389_s25  ;;  %v1665_v35 = vld [vmem:[%s1456_s24 + $0x48] sm:$0xff] }
  0x38   : > { %2159 = vst [vmem:[#allocation8_spill] sm:$0xff] %v1665_v35  ;;  %v269_v48 = vrot.slane %v1665_v35, 1  ;;  %v310_v13 = vrot.slane %v1665_v35, 2 }
  0x3a   : > { %v271_v58 = vsel %vm253_vm0, %v269_v48, %v270_v49 }
  0x3b   : > { %523 = vrot.lane.b32.xlu1 %v1547_v42, %s1392_s28  ;;  %507 = vrot.lane.b32.xlu0 %v263_v43, %s1392_s28 }
  0x3f   : > { %569 = vrot.lane.b32.xlu1 %v1556_v46, %s1393_s29  ;;  %553 = vrot.lane.b32.xlu0 %v302_v47, %s1393_s29 }
  0x43   : > { %383 = vrot.lane.b32.xlu1 %v1547_v42, %s1389_s25  ;;  %367 = vrot.lane.b32.xlu0 %v263_v43, %s1389_s25  ;;  %v1686_v43 = vld [vmem:[%s1456_s24 + $0xb0] sm:$0xff] }
  0x44   : > { %2160 = vst [vmem:[#allocation9_spill] sm:$0xff] %v1686_v43 }
  0x47   : > { %429 = vrot.lane.b32.xlu1 %v1556_v46, %s1390_s26  ;;  %413 = vrot.lane.b32.xlu0 %v302_v47, %s1390_s26  ;;  %v290_v47 = vrot.slane %v1686_v43, 1 }
  0x49   : > { %v291_v57 = vsel %vm253_vm0, %v289_v45, %v290_v47 }
  0x4b   : > { %571 = vrot.lane.b32.xlu1 %v1569_v50, %s1393_s29  ;;  %555 = vrot.lane.b32.xlu0 %v304_v51, %s1393_s29 }
  0x4f   : > { %617 = vrot.lane.b32.xlu1 %v1576_v52, %s1394_s30  ;;  %601 = vrot.lane.b32.xlu0 %v1579_v53, %s1394_s30 }
  0x53   : > { %431 = vrot.lane.b32.xlu1 %v1569_v50, %s1390_s26  ;;  %415 = vrot.lane.b32.xlu0 %v304_v51, %s1390_s26 }
  0x57   : > { %477 = vrot.lane.b32.xlu1 %v1576_v52, %s1391_s27  ;;  %461 = vrot.lane.b32.xlu0 %v1579_v53, %s1391_s27 }
  0x5b   : > { %619 = vrot.lane.b32.xlu1 %v1589_v54, %s1394_s30  ;;  %603 = vrot.lane.b32.xlu0 %v1592_v55, %s1394_s30 }
  0x5f   : > { %665 = vrot.lane.b32.xlu1 %v286_v60, %s1395_s4  ;;  %649 = vrot.lane.b32.xlu0 %v266_v61, %s1395_s4 }
  0x63   : > { %479 = vrot.lane.b32.xlu1 %v1589_v54, %s1391_s27  ;;  %463 = vrot.lane.b32.xlu0 %v1592_v55, %s1391_s27 }
  0x67   : > { %525 = vrot.lane.b32.xlu1 %v286_v60, %s1392_s28  ;;  %509 = vrot.lane.b32.xlu0 %v266_v61, %s1392_s28 }
  0x6b   : > { %667 = vrot.lane.b32.xlu1 %v288_v11, %s1395_s4  ;;  %651 = vrot.lane.b32.xlu0 %v268_v12, %s1395_s4 }
  0x6f   : > { %713 = vrot.lane.b32.xlu1 %v327_v19, %s1396_s20  ;;  %697 = vrot.lane.b32.xlu0 %v307_v21, %s1396_s20 }
  0x73   : > { %385 = vrot.lane.b32.xlu1 %v286_v60, %s1389_s25  ;;  %369 = vrot.lane.b32.xlu0 %v266_v61, %s1389_s25  ;;  %v222_v61 = vld [vmem:[%s1456_s24 + $0xb8] sm:$0x3] }
  0x74   : > { %v292_v3 = vrot.slane %v222_v61, 1  ;;  %v333_v45 = vrot.slane %v222_v61, 2 }
  0x76   : > { %v293_v8 = vsel %vm253_vm0, %v290_v47, %v292_v3  ;;  %v313_v47 = vrot.slane %v210_v62, 2 }
  0x77   : > { %527 = vrot.lane.b32.xlu1 %v288_v11, %s1392_s28  ;;  %511 = vrot.lane.b32.xlu0 %v268_v12, %s1392_s28 }
  0x7b   : > { %573 = vrot.lane.b32.xlu1 %v327_v19, %s1393_s29  ;;  %557 = vrot.lane.b32.xlu0 %v307_v21, %s1393_s29 }
  0x7f   : > { %715 = vrot.lane.b32.xlu1 %v329_v31, %s1396_s20  ;;  %699 = vrot.lane.b32.xlu0 %v309_v32, %s1396_s20 }
  0x83   : > { %387 = vrot.lane.b32.xlu1 %v288_v11, %s1389_s25  ;;  %371 = vrot.lane.b32.xlu0 %v268_v12, %s1389_s25  ;;  %v330_v11 = vrot.slane %v1662_v33, 2  ;;  %v331_v12 = vrot.slane %v1686_v43, 2 }
  0x87   : > { %433 = vrot.lane.b32.xlu1 %v327_v19, %s1390_s26  ;;  %417 = vrot.lane.b32.xlu0 %v307_v21, %s1390_s26  ;;  %v332_v19 = vsel %vm294_vm1, %v330_v11, %v331_v12  ;;  %v312_v21 = vsel %vm294_vm1, %v310_v13, %v311_v14 }
  0x8b   : > { %575 = vrot.lane.b32.xlu1 %v329_v31, %s1393_s29  ;;  %559 = vrot.lane.b32.xlu0 %v309_v32, %s1393_s29 }
  0x8d   : > { %v1667_v36 = vpop.permute.xlu1 %363  ;;  %v1669_v37 = vpop.permute.xlu0 %361 }
  0x8f   : > { %621 = vrot.lane.b32.xlu1 %v1662_v33, %s1394_s30  ;;  %605 = vrot.lane.b32.xlu0 %v1665_v35, %s1394_s30 }
  0x91   : > { %v1675_v38 = vpop.permute.xlu1 %379  ;;  %v1677_v39 = vpop.permute.xlu0 %377 }
  0x93   : > { %435 = vrot.lane.b32.xlu1 %v329_v31, %s1390_s26  ;;  %419 = vrot.lane.b32.xlu0 %v309_v32, %s1390_s26 }
  0x95   : > { %v1681_v40 = vpop.permute.xlu1 %425  ;;  %v1683_v41 = vpop.permute.xlu0 %409 }
  0x97   : > { %481 = vrot.lane.b32.xlu1 %v1662_v33, %s1391_s27  ;;  %465 = vrot.lane.b32.xlu0 %v1665_v35, %s1391_s27 }
  0x99   : > { %v1699_v51 = vpop.permute.xlu1 %427  ;;  %v1701_v56 = vpop.permute.xlu0 %411 }
  0x9b   : > { %623 = vrot.lane.b32.xlu1 %v1686_v43, %s1394_s30  ;;  %607 = vrot.lane.b32.xlu0 %v1689_v44, %s1394_s30 }
  0x9d   : > { %v1709_v59 = vpop.permute.xlu1 %473  ;;  %v1711_v60 = vpop.permute.xlu0 %457 }
  0x9f   : > { %669 = vrot.lane.b32.xlu1 %v291_v57, %s1395_s4  ;;  %653 = vrot.lane.b32.xlu0 %v271_v58, %s1395_s4 }
  0xa1   : > { %v1717_v63 = vpop.permute.xlu1 %475  ;;  %v1719_v1 = vpop.permute.xlu0 %459 }
  0xa3   : > { %483 = vrot.lane.b32.xlu1 %v1686_v43, %s1391_s27  ;;  %467 = vrot.lane.b32.xlu0 %v1689_v44, %s1391_s27  ;;  %v1801_v43 = vld [vmem:[%s1456_s24 + $0xc8] sm:$0xff] }
  0xa4   : > { %v339_v46 = vrot.slane %v1801_v43, 1 }
  0xa5   : > { %v1725_v5 = vpop.permute.xlu1 %521  ;;  %v1727_v7 = vpop.permute.xlu0 %505 }
  0xa7   : > { %529 = vrot.lane.b32.xlu1 %v291_v57, %s1392_s28  ;;  %513 = vrot.lane.b32.xlu0 %v271_v58, %s1392_s28 }
  0xa9   : > { %v382_v15 = vpop.permute.xlu1 %381  ;;  %v366_v18 = vpop.permute.xlu0 %365 }
  0xaa   : > { %v756_v35 = vsel %vm745_vm3, %v1509_v26, %v382_v15  ;;  %v748_v33 = vsel %vm745_vm3, %v1512_v27, %v366_v18 }
  0xab   : > { %671 = vrot.lane.b32.xlu1 %v293_v8, %s1395_s4  ;;  %655 = vrot.lane.b32.xlu0 %v273_v9, %s1395_s4 }
  0xad   : > { %v1741_v22 = vpop.permute.xlu1 %523  ;;  %v1743_v23 = vpop.permute.xlu0 %507 }
  0xaf   : > { %717 = vrot.lane.b32.xlu1 %v332_v19, %s1396_s20  ;;  %701 = vrot.lane.b32.xlu0 %v312_v21, %s1396_s20 }
  0xb1   : > { %v1747_v25 = vpop.permute.xlu1 %569  ;;  %v1749_v30 = vpop.permute.xlu0 %553 }
  0xb3   : > { %389 = vrot.lane.b32.xlu1 %v291_v57, %s1389_s25  ;;  %373 = vrot.lane.b32.xlu0 %v271_v58, %s1389_s25  ;;  %v334_v57 = vsel %vm294_vm1, %v331_v12, %v333_v45  ;;  %v314_v58 = vsel %vm294_vm1, %v311_v14, %v313_v47  ;;  %v1784_v45 = vld [vmem:[%s1456_s24 + $0xc0] sm:$0xff] }
  0xb4   : > { %v338_v50 = vrot.slane %v1784_v45, 1 }
  0xb5   : > { %v1753_v31 = vpop.permute.xlu1 %383  ;;  %v1755_v32 = vpop.permute.xlu0 %367 }
  0xb7   : > { %531 = vrot.lane.b32.xlu1 %v293_v8, %s1392_s28  ;;  %515 = vrot.lane.b32.xlu0 %v273_v9, %s1392_s28 }
  0xb9   : > { %v430_v48 = vpop.permute.xlu1 %429  ;;  %v414_v49 = vpop.permute.xlu0 %413 }
  0xbb   : > { %577 = vrot.lane.b32.xlu1 %v332_v19, %s1393_s29  ;;  %561 = vrot.lane.b32.xlu0 %v312_v21, %s1393_s29 }
  0xbd   : > { %v1763_v3 = vpop.permute.xlu1 %571  ;;  %v1765_v4 = vpop.permute.xlu0 %555 }
  0xbf   : > { %719 = vrot.lane.b32.xlu1 %v334_v57, %s1396_s20  ;;  %703 = vrot.lane.b32.xlu0 %v314_v58, %s1396_s20 }
  0xc1   : > { %v1769_v61 = vpop.permute.xlu1 %617  ;;  %v1771_v62 = vpop.permute.xlu0 %601 }
  0xc3   : > { %391 = vrot.lane.b32.xlu1 %v293_v8, %s1389_s25  ;;  %375 = vrot.lane.b32.xlu0 %v273_v9, %s1389_s25  ;;  %s1207_s25 = sshll.u32 %s2182_s13, 5 }
  0xc5   : > { %v1775_v11 = vpop.permute.xlu1 %431  ;;  %v1777_v12 = vpop.permute.xlu0 %415 }
  0xc7   : > { %437 = vrot.lane.b32.xlu1 %v332_v19, %s1390_s26  ;;  %421 = vrot.lane.b32.xlu0 %v312_v21, %s1390_s26 }
  0xc9   : > { %v478_v13 = vpop.permute.xlu1 %477  ;;  %v462_v14 = vpop.permute.xlu0 %461 }
  0xcb   : > { %579 = vrot.lane.b32.xlu1 %v334_v57, %s1393_s29  ;;  %563 = vrot.lane.b32.xlu0 %v314_v58, %s1393_s29 }
  0xcd   : > { %v1786_v8 = vpop.permute.xlu1 %619  ;;  %v1788_v9 = vpop.permute.xlu0 %603 }
  0xcf   : > { %625 = vrot.lane.b32.xlu1 %v1784_v45, %s1394_s30  ;;  %609 = vrot.lane.b32.xlu0 %v1473_v10, %s1394_s30 }
  0xd1   : > { %v666_v19 = vpop.permute.xlu1 %665  ;;  %v650_v21 = vpop.permute.xlu0 %649 }
  0xd3   : > { %439 = vrot.lane.b32.xlu1 %v334_v57, %s1390_s26  ;;  %423 = vrot.lane.b32.xlu0 %v314_v58, %s1390_s26  ;;  %v773_v57 = vsel %vm762_vm4, %v756_v35, %v430_v48  ;;  %v765_v58 = vsel %vm762_vm4, %v748_v33, %v414_v49  ;;  %v746_v33 = vsel %vm745_vm3, %v1463_v2, %v1669_v37 }
  0xd4   : > { %v790_v15 = vsel %vm779_vm5, %v773_v57, %v478_v13  ;;  %v782_v42 = vsel %vm779_vm5, %v765_v58, %v462_v14  ;;  %v754_v35 = vsel %vm745_vm3, %v1473_v10, %v1677_v39  ;;  %v340_v49 = vsel %vm253_vm0, %v338_v50, %v339_v46 }
  0xd5   : > { %v1796_v47 = vpop.permute.xlu1 %479  ;;  %v1798_v44 = vpop.permute.xlu0 %463  ;;  %v771_v48 = vsel %vm762_vm4, %v754_v35, %v1681_v40  ;;  %v344_v35 = vrot.slane %v1801_v43, 2 }
  0xd6   : > { %v788_v2 = vsel %vm779_vm5, %v771_v48, %v1709_v59 }
  0xd7   : > { %485 = vrot.lane.b32.xlu1 %v1784_v45, %s1391_s27  ;;  %469 = vrot.lane.b32.xlu0 %v1473_v10, %s1391_s27  ;;  %v805_v13 = vsel %vm796_vm6, %v788_v2, %v1725_v5 }
  0xd8   : > { %v822_v50 = vsel %vm813_vm7, %v805_v13, %v1747_v25 }
  0xd9   : > { %v526_v27 = vpop.permute.xlu1 %525  ;;  %v510_v18 = vpop.permute.xlu0 %509  ;;  %v839_v59 = vsel %vm830_vm8, %v822_v50, %v1769_v61 }
  0xda   : > { %v1818_v34 = vsel %vm796_vm6, %v790_v15, %v526_v27  ;;  %v1821_v55 = vsel %vm796_vm6, %v782_v42, %v510_v18  ;;  %v763_v42 = vsel %vm762_vm4, %v746_v33, %v1683_v41  ;;  %v856_v5 = vsel %vm847_vm9, %v839_v59, %v666_v19 }
  0xdb   : > { %627 = vrot.lane.b32.xlu1 %v1801_v43, %s1394_s30  ;;  %611 = vrot.lane.b32.xlu0 %v1468_v6, %s1394_s30  ;;  %v780_v10 = vsel %vm779_vm5, %v763_v42, %v1711_v60  ;;  %v749_v15 = vsel %vm745_vm3, %v1518_v29, %v1755_v32  ;;  %v343_v27 = vrot.slane %v1784_v45, 2 }
  0xdc   : > { %v797_v40 = vsel %vm796_vm6, %v780_v10, %v1727_v7  ;;  %v766_v33 = vsel %vm762_vm4, %v749_v15, %v1777_v12 }
  0xdd   : > { %v668_v37 = vpop.permute.xlu1 %667  ;;  %v652_v39 = vpop.permute.xlu0 %651  ;;  %v814_v41 = vsel %vm813_vm7, %v797_v40, %v1749_v30  ;;  %v225_v30 = vld [vmem:[%s1456_s24 + $0xd0] sm:$0x3]  ;;  %v783_v32 = vsel %vm779_vm5, %v766_v33, %v1798_v44 }
  0xde   : > { %v831_v60 = vsel %vm830_vm8, %v814_v41, %v1771_v62  ;;  %v341_v61 = vrot.slane %v225_v30, 1 }
  0xdf   : > { %673 = vrot.lane.b32.xlu1 %v340_v49, %s1395_s4  ;;  %657 = vrot.lane.b32.xlu0 %v1486_v17, %s1395_s4  ;;  %v848_v7 = vsel %vm847_vm9, %v831_v60, %v650_v21  ;;  %v757_v21 = vsel %vm745_vm3, %v1515_v28, %v1753_v31 }
  0xe0   : > { %v774_v18 = vsel %vm762_vm4, %v757_v21, %v1775_v11  ;;  %v342_v31 = vsel %vm253_vm0, %v339_v46, %v341_v61  ;;  %v755_v46 = vsel %vm745_vm3, %v1468_v6, %v1675_v38 }
  0xe1   : > { %v714_v25 = vpop.permute.xlu1 %713  ;;  %v698_v14 = vpop.permute.xlu0 %697  ;;  %v791_v29 = vsel %vm779_vm5, %v774_v18, %v1796_v47  ;;  %v345_v47 = vsel %vm294_vm1, %v343_v27, %v344_v35 }
  0xe2   : > { %v873_v57 = vsel %vm864_vm10, %v856_v5, %v714_v25  ;;  %v865_v58 = vsel %vm864_vm10, %v848_v7, %v698_v14  ;;  %v227_v7 = vld [vmem:[%s1456_s24 + $0xe0] sm:$0xff] }
  0xe3   : > { %487 = vrot.lane.b32.xlu1 %v1801_v43, %s1391_s27  ;;  %1274 = vmatprep.mubr.msk.f32.mxu1 %vm893_vm11, %v873_v57  ;;  %v772_v43 = vsel %vm762_vm4, %v755_v46, %v1699_v51  ;;  %v352_v14 = vrot.slane %v227_v7, 1  ;;  %v2162_v57 = vld [vmem:[#allocation6_spill] sm:$0xff] }
  0xe4   : > { %471 = vrot.lane.b32.xlu0 %v1468_v6, %s1391_s27  ;;  %1262 = vmatprep.mubr.msk.f32.mxu0 %vm893_vm11, %v865_v58 }
  0xe5   : > { %v386_v62 = vpop.permute.xlu1 %385  ;;  %v370_v19 = vpop.permute.xlu0 %369 }
  0xe6   : > { %v758_v13 = vsel %vm745_vm3, %v1576_v52, %v386_v62  ;;  %v226_v52 = vld [vmem:[%s1456_s24 + $0xd8] sm:$0xff] }
  0xe7   : > { %533 = vrot.lane.b32.xlu1 %v340_v49, %s1392_s28  ;;  %v351_v25 = vrot.slane %v226_v52, 1 }
  0xe8   : > { %517 = vrot.lane.b32.xlu0 %v1486_v17, %s1392_s28  ;;  %v747_v17 = vsel %vm745_vm3, %v1459_v0, %v1667_v36  ;;  %v789_v0 = vsel %vm779_vm5, %v772_v43, %v1717_v63 }
  0xe9   : > { %v528_v45 = vpop.permute.xlu1 %527  ;;  %v512_v48 = vpop.permute.xlu0 %511  ;;  %v764_v44 = vsel %vm762_vm4, %v747_v17, %v1701_v56  ;;  %v806_v51 = vsel %vm796_vm6, %v789_v0, %v1741_v22 }
  0xea   : > { %v1889_v11 = vsel %vm796_vm6, %v791_v29, %v528_v45  ;;  %v1892_v12 = vsel %vm796_vm6, %v783_v32, %v512_v48  ;;  %v781_v36 = vsel %vm779_vm5, %v764_v44, %v1719_v1  ;;  %v823_v42 = vsel %vm813_vm7, %v806_v51, %v1763_v3  ;;  %v2163_v29 = vld [vmem:[#allocation2_spill] sm:$0xff]  ;;  %v2164_v48 = vld [vmem:[#allocation3_spill] sm:$0xff] }
  0xeb   : > { %675 = vrot.lane.b32.xlu1 %v342_v31, %s1395_s4  ;;  %v798_v56 = vsel %vm796_vm6, %v781_v36, %v1743_v23  ;;  %v840_v63 = vsel %vm830_vm8, %v823_v42, %v1786_v8  ;;  %v346_v8 = vrot.slane %v225_v30, 2 }
  0xec   : > { %659 = vrot.lane.b32.xlu0 %v1483_v16, %s1395_s4  ;;  %v815_v49 = vsel %vm813_vm7, %v798_v56, %v1765_v4  ;;  %v857_v22 = vsel %vm847_vm9, %v840_v63, %v668_v37 }
  0xed   : > { %v1912_v6 = vpop.permute.xlu1 %573  ;;  %v1914_v38 = vpop.permute.xlu0 %557  ;;  %v832_v1 = vsel %vm830_vm8, %v815_v49, %v1788_v9  ;;  %v2166_v49 = vld [vmem:[#allocation5_spill] sm:$0xff] }
  0xee   : > { %v849_v23 = vsel %vm847_vm9, %v832_v1, %v652_v39  ;;  %v347_v39 = vsel %vm294_vm1, %v344_v35, %v346_v8  ;;  %v356_v35 = vrot.slane %v226_v52, 2 }
  0xef   : > { %721 = vrot.lane.b32.xlu1 %v345_v47, %s1396_s20 }
  0xf0   : > { %705 = vrot.lane.b32.xlu0 %v1495_v20, %s1396_s20 }
  0xf1   : > { %v716_v2 = vpop.permute.xlu1 %715  ;;  %v700_v3 = vpop.permute.xlu0 %699 }
  0xf2   : > { %v874_v10 = vsel %vm864_vm10, %v857_v22, %v716_v2  ;;  %v866_v4 = vsel %vm864_vm10, %v849_v23, %v700_v3 }
  0xf3   : > { %535 = vrot.lane.b32.xlu1 %v342_v31, %s1392_s28  ;;  %1275 = vmatmul.mubr.msk.f32.vlgmr.msra.gmra.mrb[0].mxu1 %vm893_vm11, %v874_v10  ;;  %v357_v31 = vrot.slane %v227_v7, 2  ;;  %v824_v10 = vsel %vm813_vm7, %v1818_v34, %v1912_v6 }
  0xf4   : > { %519 = vrot.lane.b32.xlu0 %v1483_v16, %s1392_s28  ;;  %1263 = vmatmul.mubr.msk.f32.vlgmr.msra.gmra.mrb[0].mxu0 %vm893_vm11, %v866_v4  ;;  %v750_v16 = vsel %vm745_vm3, %v1579_v53, %v370_v19  ;;  %v816_v4 = vsel %vm813_vm7, %v1821_v55, %v1914_v38 }
  0xf5   : > { %v388_v9 = vpop.permute.xlu1 %387  ;;  %v372_v37 = vpop.permute.xlu0 %371  ;;  %v358_v17 = vsel %vm294_vm1, %v356_v35, %v357_v31 }
  0xf6   : > { %v759_v30 = vsel %vm745_vm3, %v1589_v54, %v388_v9  ;;  %v751_v58 = vsel %vm745_vm3, %v2162_v57, %v372_v37 }
  0xf7   : > { %581 = vrot.lane.b32.xlu1 %v345_v47, %s1393_s29  ;;  %v2165_v47 = vld [vmem:[#allocation4_spill] sm:$0xff] }
  0xf8   : > { %565 = vrot.lane.b32.xlu0 %v1495_v20, %s1393_s29 }
  0xf9   : > { %v434_v40 = vpop.permute.xlu1 %433  ;;  %v418_v50 = vpop.permute.xlu0 %417 }
  0xfa   : > { %v775_v41 = vsel %vm762_vm4, %v758_v13, %v434_v40  ;;  %v767_v59 = vsel %vm762_vm4, %v750_v16, %v418_v50 }
  0xfb   : > { %723 = vrot.lane.b32.xlu1 %v347_v39, %s1396_s20 }
  0xfc   : > { %707 = vrot.lane.b32.xlu0 %v1502_v24, %s1396_s20 }
  0xfd   : > { %v1953_v20 = vpop.permute.xlu1 %575  ;;  %v1955_v60 = vpop.permute.xlu0 %559 }
  0xff   : > { %583 = vrot.lane.b32.xlu1 %v347_v39, %s1393_s29 }
 0x100   : > { %567 = vrot.lane.b32.xlu0 %v1502_v24, %s1393_s29  ;;  %v228_v24 = vld [vmem:[%s1456_s24 + $0xe8] sm:$0x3]  ;;  %s1206_s24 = sshll.u32 %s2184_s23, 1 }
 0x101   : > { %v622_v53 = vpop.permute.xlu1 %621  ;;  %v606_v5 = vpop.permute.xlu0 %605  ;;  %v354_v15 = vrot.slane %v228_v24, 1  ;;  %v359_v46 = vrot.slane %v228_v24, 2  ;;  %s192_s26 = sadd.s32 %s1207_s25, %s1206_s24 }
 0x102   : > { %v841_v8 = vsel %vm830_vm8, %v824_v10, %v622_v53  ;;  %v833_v9 = vsel %vm830_vm8, %v816_v4, %v606_v5  ;;  %v825_v5 = vsel %vm813_vm7, %v1889_v11, %v1953_v20  ;;  %v2167_v20 = vld [vmem:[#allocation7_spill] sm:$0xff]  ;;  %s1208_s27 = sshll.u32 %s192_s26, 3 }
 0x103   : > { %629 = vrot.lane.b32.xlu1 %v226_v52, %s1394_s30  ;;  %v355_v32 = vsel %vm253_vm0, %v352_v14, %v354_v15  ;;  %v360_v0 = vsel %vm294_vm1, %v357_v31, %v359_v46  ;;  %s2107_s5 = scalar_lea.vmem %s2143_s3, %s1208_s27 }
 0x104   : > { %613 = vrot.lane.b32.xlu0 %v1509_v26, %s1394_s30  ;;  %v353_v26 = vsel %vm253_vm0, %v351_v25, %v352_v14 }
 0x105   : > { %v436_v61 = vpop.permute.xlu1 %435  ;;  %v420_v62 = vpop.permute.xlu0 %419 }
 0x106   : > { %v776_v19 = vsel %vm762_vm4, %v759_v30, %v436_v61  ;;  %v768_v21 = vsel %vm762_vm4, %v751_v58, %v420_v62 }
 0x107   : > { %631 = vrot.lane.b32.xlu1 %v227_v7, %s1394_s30  ;;  %v817_v7 = vsel %vm813_vm7, %v1892_v12, %v1955_v60 }
 0x108   : > { %615 = vrot.lane.b32.xlu0 %v1515_v28, %s1394_s30 }
 0x109   : > { %v482_v27 = vpop.permute.xlu1 %481  ;;  %v466_v54 = vpop.permute.xlu0 %465 }
 0x10a   : > { %v792_v18 = vsel %vm779_vm5, %v775_v41, %v482_v27  ;;  %v784_v33 = vsel %vm779_vm5, %v767_v59, %v466_v54 }
 0x10b   : > { %677 = vrot.lane.b32.xlu1 %v353_v26, %s1395_s4 }
 0x10c   : > { %661 = vrot.lane.b32.xlu0 %v2163_v29, %s1395_s4 }
 0x10d   : > { %v624_v45 = vpop.permute.xlu1 %623  ;;  %v608_v28 = vpop.permute.xlu0 %607 }
 0x10e   : > { %v842_v25 = vsel %vm830_vm8, %v825_v5, %v624_v45  ;;  %v834_v14 = vsel %vm830_vm8, %v817_v7, %v608_v28 }
 0x10f   : > { %679 = vrot.lane.b32.xlu1 %v355_v32, %s1395_s4 }
 0x110   : > { %663 = vrot.lane.b32.xlu0 %v2164_v48, %s1395_s4 }
 0x111   : > { %v670_v43 = vpop.permute.xlu1 %669  ;;  %v654_v44 = vpop.permute.xlu0 %653 }
 0x112   : > { %v858_v37 = vsel %vm847_vm9, %v841_v8, %v670_v43  ;;  %v850_v39 = vsel %vm847_vm9, %v833_v9, %v654_v44 }
 0x113   : > { %725 = vrot.lane.b32.xlu1 %v358_v17, %s1396_s20 }
 0x114   : > { %709 = vrot.lane.b32.xlu0 %v2165_v47, %s1396_s20 }
 0x115   : > { %v484_v36 = vpop.permute.xlu1 %483  ;;  %v468_v51 = vpop.permute.xlu0 %467 }
 0x116   : > { %v793_v56 = vsel %vm779_vm5, %v776_v19, %v484_v36  ;;  %v785_v42 = vsel %vm779_vm5, %v768_v21, %v468_v51  ;;  %v2168_v19 = vld [vmem:[#allocation8_spill] sm:$0xff] }
 0x117   : > { %727 = vrot.lane.b32.xlu1 %v360_v0, %s1396_s20 }
 0x118   : > { %711 = vrot.lane.b32.xlu0 %v2166_v49, %s1396_s20 }
 0x119   : > { %v530_v63 = vpop.permute.xlu1 %529  ;;  %v514_v1 = vpop.permute.xlu0 %513 }
 0x11a   : > { %v1996_v22 = vsel %vm796_vm6, %v792_v18, %v530_v63  ;;  %v1999_v23 = vsel %vm796_vm6, %v784_v33, %v514_v1 }
 0x11d   : > { %v672_v2 = vpop.permute.xlu1 %671  ;;  %v656_v3 = vpop.permute.xlu0 %655 }
 0x11e   : > { %v859_v30 = vsel %vm847_vm9, %v842_v25, %v672_v2  ;;  %v851_v57 = vsel %vm847_vm9, %v834_v14, %v656_v3 }
 0x121   : > { %v718_v13 = vpop.permute.xlu1 %717  ;;  %v702_v16 = vpop.permute.xlu0 %701 }
 0x122   : > { %v875_v40 = vsel %vm864_vm10, %v858_v37, %v718_v13  ;;  %v867_v50 = vsel %vm864_vm10, %v850_v39, %v702_v16 }
 0x123   : > { %1265 = vmatprep.mubr.msk.f32.mxu0 %vm893_vm11, %v867_v50  ;;  %1277 = vmatprep.mubr.msk.f32.mxu1 %vm893_vm11, %v875_v40 }
 0x125   : > { %v390_v34 = vpop.permute.xlu1 %389  ;;  %v374_v55 = vpop.permute.xlu0 %373 }
 0x126   : > { %v760_v60 = vsel %vm745_vm3, %v2167_v20, %v390_v34  ;;  %v752_v21 = vsel %vm745_vm3, %v2168_v19, %v374_v55 }
 0x129   : > { %v532_v6 = vpop.permute.xlu1 %531  ;;  %v516_v38 = vpop.permute.xlu0 %515 }
 0x12a   : > { %v810_v41 = vsel %vm796_vm6, %v793_v56, %v532_v6  ;;  %v802_v59 = vsel %vm796_vm6, %v785_v42, %v516_v38 }
 0x12d   : > { %v578_v52 = vpop.permute.xlu1 %577  ;;  %v562_v53 = vpop.permute.xlu0 %561 }
 0x12e   : > { %v826_v42 = vsel %vm813_vm7, %v1996_v22, %v578_v52  ;;  %v818_v49 = vsel %vm813_vm7, %v1999_v23, %v562_v53 }
 0x131   : > { %v720_v58 = vpop.permute.xlu1 %719  ;;  %v704_v61 = vpop.permute.xlu0 %703 }
 0x132   : > { %v876_v62 = vsel %vm864_vm10, %v859_v30, %v720_v58  ;;  %v868_v24 = vsel %vm864_vm10, %v851_v57, %v704_v61 }
 0x133   : > { %1266 = vmatmul.mubr.msk.f32.gmra.mrb[2].mxu0 %vm893_vm11, %v868_v24  ;;  %1278 = vmatmul.mubr.msk.f32.gmra.mrb[2].mxu1 %vm893_vm11, %v876_v62 }
 0x135   : > { %v2031_v11 = vpop.permute.xlu1 %391  ;;  %v2033_v12 = vpop.permute.xlu0 %375 }
 0x139   : > { %v438_v26 = vpop.permute.xlu1 %437  ;;  %v422_v15 = vpop.permute.xlu0 %421 }
 0x13a   : > { %v777_v27 = vsel %vm762_vm4, %v760_v60, %v438_v26  ;;  %v769_v54 = vsel %vm762_vm4, %v752_v21, %v422_v15  ;;  %v2169_v60 = vld [vmem:[#allocation9_spill] sm:$0xff]  ;;  %v2170_v15 = vld [vmem:[#allocation10_spill] sm:$0xff] }
 0x13b   : > { %v761_v19 = vsel %vm745_vm3, %v2169_v60, %v2031_v11 }
 0x13d   : > { %v580_v18 = vpop.permute.xlu1 %579  ;;  %v564_v33 = vpop.permute.xlu0 %563 }
 0x13e   : > { %v827_v13 = vsel %vm813_vm7, %v810_v41, %v580_v18  ;;  %v819_v16 = vsel %vm813_vm7, %v802_v59, %v564_v33  ;;  %v753_v18 = vsel %vm745_vm3, %v2170_v15, %v2033_v12 }
 0x141   : > { %v626_v35 = vpop.permute.xlu1 %625  ;;  %v610_v31 = vpop.permute.xlu0 %609 }
 0x142   : > { %v843_v63 = vsel %vm830_vm8, %v826_v42, %v626_v35  ;;  %v835_v1 = vsel %vm830_vm8, %v818_v49, %v610_v31 }
 0x145   : > { %v440_v29 = vpop.permute.xlu1 %439  ;;  %v424_v32 = vpop.permute.xlu0 %423 }
 0x146   : > { %v770_v35 = vsel %vm762_vm4, %v753_v18, %v424_v32 }
 0x149   : > { %v486_v45 = vpop.permute.xlu1 %485  ;;  %v470_v28 = vpop.permute.xlu0 %469 }
 0x14a   : > { %v794_v58 = vsel %vm779_vm5, %v777_v27, %v486_v45  ;;  %v786_v62 = vsel %vm779_vm5, %v769_v54, %v470_v28  ;;  %v778_v27 = vsel %vm762_vm4, %v761_v19, %v440_v29 }
 0x14d   : > { %v628_v48 = vpop.permute.xlu1 %627  ;;  %v612_v17 = vpop.permute.xlu0 %611 }
 0x14e   : > { %v844_v40 = vsel %vm830_vm8, %v827_v13, %v628_v48  ;;  %v836_v50 = vsel %vm830_vm8, %v819_v16, %v612_v17 }
 0x151   : > { %v674_v46 = vpop.permute.xlu1 %673  ;;  %v658_v43 = vpop.permute.xlu0 %657 }
 0x152   : > { %v860_v2 = vsel %vm847_vm9, %v843_v63, %v674_v46  ;;  %v852_v10 = vsel %vm847_vm9, %v835_v1, %v658_v43 }
 0x155   : > { %v488_v44 = vpop.permute.xlu1 %487 }
 0x156   : > { %v472_v47 = vpop.permute.xlu0 %471  ;;  %v795_v31 = vsel %vm779_vm5, %v778_v27, %v488_v44 }
 0x157   : > { %v787_v48 = vsel %vm779_vm5, %v770_v35, %v472_v47 }
 0x159   : > { %v534_v0 = vpop.permute.xlu1 %533 }
 0x15a   : > { %v518_v36 = vpop.permute.xlu0 %517  ;;  %v811_v24 = vsel %vm796_vm6, %v794_v58, %v534_v0 }
 0x15b   : > { %v803_v21 = vsel %vm796_vm6, %v786_v62, %v518_v36 }
 0x15d   : > { %v676_v51 = vpop.permute.xlu1 %675 }
 0x15e   : > { %v660_v56 = vpop.permute.xlu0 %659  ;;  %v861_v34 = vsel %vm847_vm9, %v844_v40, %v676_v51 }
 0x15f   : > { %v853_v6 = vsel %vm847_vm9, %v836_v50, %v660_v56 }
 0x161   : > { %v722_v3 = vpop.permute.xlu1 %721 }
 0x162   : > { %v877_v4 = vsel %vm864_vm10, %v860_v2, %v722_v3  ;;  %v706_v8 = vpop.permute.xlu0 %705  ;;  %v1211_v2 = vld [vmem:[%s2142_s2] ss:$0 sm:$0xff] }
 0x163   : > { %v869_v9 = vsel %vm864_vm10, %v852_v10, %v706_v8  ;;  %1280 = vmatprep.mubr.msk.f32.mxu1 %vm893_vm11, %v877_v4 }
 0x164   : > { %1268 = vmatprep.mubr.msk.f32.mxu0 %vm893_vm11, %v869_v9 }
 0x165   : > { %v536_v22 = vpop.permute.xlu1 %535 }
 0x166   : > { %v520_v23 = vpop.permute.xlu0 %519  ;;  %v812_v17 = vsel %vm796_vm6, %v795_v31, %v536_v22 }
 0x167   : > { %v804_v43 = vsel %vm796_vm6, %v787_v48, %v520_v23 }
 0x169   : > { %v582_v37 = vpop.permute.xlu1 %581 }
 0x16a   : > { %v566_v39 = vpop.permute.xlu0 %565  ;;  %v828_v26 = vsel %vm813_vm7, %v811_v24, %v582_v37 }
 0x16b   : > { %v820_v33 = vsel %vm813_vm7, %v803_v21, %v566_v39 }
 0x16d   : > { %v724_v55 = vpop.permute.xlu1 %723 }
 0x16e   : > { %v878_v38 = vsel %vm864_vm10, %v861_v34, %v724_v55  ;;  %v708_v52 = vpop.permute.xlu0 %707 }
 0x16f   : > { %v870_v53 = vsel %vm864_vm10, %v853_v6, %v708_v52  ;;  %1281 = vmatmul.mubr.msk.f32.gmra.mrb[4].mxu1 %vm893_vm11, %v878_v38 }
 0x170   : > { %1269 = vmatmul.mubr.msk.f32.gmra.mrb[4].mxu0 %vm893_vm11, %v870_v53 }
 0x171   : > { %v584_v41 = vpop.permute.xlu1 %583 }
 0x172   : > { %v568_v59 = vpop.permute.xlu0 %567  ;;  %v829_v32 = vsel %vm813_vm7, %v812_v17, %v584_v41 }
 0x173   : > { %v821_v0 = vsel %vm813_vm7, %v804_v43, %v568_v59 }
 0x175   : > { %v630_v5 = vpop.permute.xlu1 %629 }
 0x176   : > { %v614_v7 = vpop.permute.xlu0 %613  ;;  %v845_v54 = vsel %vm830_vm8, %v828_v26, %v630_v5 }
 0x177   : > { %v837_v11 = vsel %vm830_vm8, %v820_v33, %v614_v7 }
 0x179   : > { %v632_v25 = vpop.permute.xlu1 %631 }
 0x17a   : > { %v616_v14 = vpop.permute.xlu0 %615  ;;  %v846_v47 = vsel %vm830_vm8, %v829_v32, %v632_v25 }
 0x17b   : > { %v838_v36 = vsel %vm830_vm8, %v821_v0, %v616_v14 }
 0x17d   : > { %v678_v30 = vpop.permute.xlu1 %677 }
 0x17e   : > { %v662_v57 = vpop.permute.xlu0 %661  ;;  %v862_v45 = vsel %vm847_vm9, %v845_v54, %v678_v30 }
 0x17f   : > { %v854_v12 = vsel %vm847_vm9, %v837_v11, %v662_v57 }
 0x181   : > { %v680_v61 = vpop.permute.xlu1 %679 }
 0x182   : > { %v664_v20 = vpop.permute.xlu0 %663  ;;  %v863_v51 = vsel %vm847_vm9, %v846_v47, %v680_v61 }
 0x183   : > { %v855_v42 = vsel %vm847_vm9, %v838_v36, %v664_v20 }
 0x185   : > { %v726_v28 = vpop.permute.xlu1 %725 }
 0x186   : > { %v879_v29 = vsel %vm864_vm10, %v862_v45, %v726_v28  ;;  %v710_v46 = vpop.permute.xlu0 %709 }
 0x187   : > { %v871_v44 = vsel %vm864_vm10, %v854_v12, %v710_v46  ;;  %1283 = vmatprep.mubr.msk.f32.mxu1 %vm893_vm11, %v879_v29 }
 0x188   : > { %1271 = vmatprep.mubr.msk.f32.mxu0 %vm893_vm11, %v871_v44 }
 0x189   : > { %v728_v56 = vpop.permute.xlu1 %727 }
 0x18a   : > { %v880_v49 = vsel %vm864_vm10, %v863_v51, %v728_v56  ;;  %v712_v63 = vpop.permute.xlu0 %711 }
 0x18b   : > { %v872_v1 = vsel %vm864_vm10, %v855_v42, %v712_v63  ;;  %1284 = vmatmul.mubr.msk.f32.gmra.mrb[6].mxu1 %vm893_vm11, %v880_v49 }
 0x18c   : > { %1272 = vmatmul.mubr.msk.f32.gmra.mrb[6].mxu0 %vm893_vm11, %v872_v1 }
 0x1c6   : > { %v1276_v3 = vpop.f32.mrb[0].mxu1 }
 0x1c7   : > { %v1264_v10 = vpop.f32.mrb[0].mxu0  ;;  %v1058_v4 = vadd.f32 %v1276_v3, %v1211_v2  ;;  %v1052_v8 = vpop.f32.mrb[1].mxu1 }
 0x1c8   : > { %v1018_v9 = vadd.f32 %v1264_v10, %v1211_v2  ;;  %v1012_v22 = vpop.f32.mrb[1].mxu0  ;;  %v1053_v23 = vadd.f32 %v1211_v2, %v1052_v8 }
 0x1c9   : > { %1100 = vst [vmem:[%s2107_s5 + $0x48] sm:$0xff] %v1058_v4  ;;  %v1013_v37 = vadd.f32 %v1211_v2, %v1012_v22 }
 0x1ca   : > { %1092 = vst [vmem:[%s2107_s5 + $0x8] sm:$0xff] %v1018_v9  ;;  %1099 = vst [vmem:[%s2107_s5 + $0x40] sm:$0xff] %v1053_v23 }
 0x1cb   : > { %1091 = vst [vmem:[%s2107_s5] sm:$0xff] %v1013_v37 }
 0x206   : > { %v1267_v39 = vpop.f32.mrb[2].mxu0  ;;  %v1279_v13 = vpop.f32.mrb[2].mxu1 }
 0x207   : > { %v1028_v16 = vadd.f32 %v1267_v39, %v1211_v2  ;;  %v1068_v40 = vadd.f32 %v1279_v13, %v1211_v2  ;;  %v1022_v50 = vpop.f32.mrb[3].mxu0  ;;  %v1062_v34 = vpop.f32.mrb[3].mxu1 }
 0x208   : > { %v1023_v55 = vadd.f32 %v1211_v2, %v1022_v50  ;;  %v1063_v6 = vadd.f32 %v1211_v2, %v1062_v34 }
 0x209   : > { %1094 = vst [vmem:[%s2107_s5 + $0x18] sm:$0xff] %v1028_v16  ;;  %1102 = vst [vmem:[%s2107_s5 + $0x58] sm:$0xff] %v1068_v40 }
 0x20a   : > { %1093 = vst [vmem:[%s2107_s5 + $0x10] sm:$0xff] %v1023_v55  ;;  %1101 = vst [vmem:[%s2107_s5 + $0x50] sm:$0xff] %v1063_v6 }
 0x242   : > { %v1282_v38 = vpop.f32.mrb[4].mxu1 }
 0x243   : > { %v1270_v52 = vpop.f32.mrb[4].mxu0  ;;  %v1078_v53 = vadd.f32 %v1282_v38, %v1211_v2  ;;  %v1072_v41 = vpop.f32.mrb[5].mxu1 }
 0x244   : > { %v1038_v59 = vadd.f32 %v1270_v52, %v1211_v2  ;;  %v1032_v5 = vpop.f32.mrb[5].mxu0  ;;  %v1073_v7 = vadd.f32 %v1211_v2, %v1072_v41 }
 0x245   : > { %1104 = vst [vmem:[%s2107_s5 + $0x68] sm:$0xff] %v1078_v53  ;;  %v1033_v25 = vadd.f32 %v1211_v2, %v1032_v5 }
 0x246   : > { %1096 = vst [vmem:[%s2107_s5 + $0x28] sm:$0xff] %v1038_v59  ;;  %1103 = vst [vmem:[%s2107_s5 + $0x60] sm:$0xff] %v1073_v7 }
 0x247   : > { %1095 = vst [vmem:[%s2107_s5 + $0x20] sm:$0xff] %v1033_v25 }
 0x25e   : > { %v1285_v14 = vpop.f32.mrb[6].mxu1 }
 0x25f   : > { %v1273_v30 = vpop.f32.mrb[6].mxu0  ;;  %v1088_v57 = vadd.f32 %v1285_v14, %v1211_v2  ;;  %v1082_v58 = vpop.f32.mrb[7].mxu1 }
 0x260   : > { %v1048_v61 = vadd.f32 %v1273_v30, %v1211_v2  ;;  %v1042_v62 = vpop.f32.mrb[7].mxu0  ;;  %v1083_v24 = vadd.f32 %v1211_v2, %v1082_v58 }
 0x261   : > { %1106 = vst [vmem:[%s2107_s5 + $0x78] sm:$0xff] %v1088_v57  ;;  %v1043_v20 = vadd.f32 %v1211_v2, %v1042_v62 }
 0x262   : > { %1098 = vst [vmem:[%s2107_s5 + $0x38] sm:$0xff] %v1048_v61  ;;  %1105 = vst [vmem:[%s2107_s5 + $0x70] sm:$0xff] %v1083_v24 }
 0x263   : > { %1097 = vst [vmem:[%s2107_s5 + $0x30] sm:$0xff] %v1043_v20 }
 0x264 PF: > { %s13_s16 = sadd.s32 1, %s1387_s16   ;;  %s2171_s12 = smov %s1379_s14 }
 0x265   : > { %p10_p7 = scmp.ge.s32.totalorder %s13_s16, 6   ;;  %s2172_s13 = smov %s1383_s15 }
 0x266   : > { %s2173_s14 = smov %s2176_s17  ;;  %s2174_s15 = smov %s2180_s18 }
 0x267   :  { %12 = sbr.rel (!%p10_p7) target bundleno = 3 (0x3), region = 63 }

</bundles_post_ra>
